<compile_context>
chip_gen: v5e
topology: v5e:2x2
jax: 0.10.0
libtpu: 0.0.40
codegen_flags: <defaults>
</compile_context>

<pallas_src>
import functools

import jax
import jax.numpy as jnp
from jax.experimental import pallas as pl
from jax.experimental.pallas import tpu as pltpu


def mha_gate_kernel(num_heads, hid,
                    x_ref, w1_ref, b1_ref, w2_ref, b2_ref, wc_ref, bc_ref,
                    o_ref):
    """One batch-tile: fused head MLPs + sigmoid gates, feature re-scale, combine."""
    x = x_ref[...]                                                     # (TB, F) f32

    # Fused first layer across all heads: one lane-dense MXU matmul (N = H*HID = 1024).
    h1 = jnp.dot(x, w1_ref[...], preferred_element_type=jnp.float32)  # (TB, H*HID)
    h1 = jnp.maximum(h1 + b1_ref[...], 0.0)                           # bias + ReLU, once

    # Linear(HID -> 1) per head as VPU mul + XLU lane reductions (MXU would waste N).
    prod = h1 * w2_ref[...]                                           # (TB, H*HID)
    gate_sum = jnp.zeros((x.shape[0], 1), jnp.float32)
    for h in range(num_heads):                                        # static, unrolled
        seg = prod[:, h * hid:(h + 1) * hid]                          # lane-aligned slice
        logit = jnp.sum(seg, axis=-1, keepdims=True) + b2_ref[h]      # b2[h]: SMEM scalar
        gate_sum = gate_sum + jax.nn.sigmoid(logit)                   # EUP

    # mean over heads of (x * w_h) == x * mean_h(w_h); the 1/H factor is folded into wc.
    combined = x * gate_sum                                           # (TB, F)

    out = jnp.dot(combined, wc_ref[...], preferred_element_type=jnp.float32)
    o_ref[...] = out + bc_ref[...]


def multi_head_attention(x, w1, b1, w2, b2, wc, bc, *, num_heads=4, tile_b=None):
    """x: (B, F).  w1: (H, F, HID), b1: (H, HID), w2: (H, HID), b2: (H,),
    wc: (F, F) (already (in, out) layout), bc: (1, F)."""
    B, F = x.shape
    H, _, HID = w1.shape
    assert H == num_heads

    # Auto-pick a large batch tile (sublane-aligned), pad B to a tile multiple.
    if tile_b is None:
        tile_b = min(max(8, ((B + 7) // 8) * 8), 512)
    B_pad = ((B + tile_b - 1) // tile_b) * tile_b
    x_in = jnp.pad(x, ((0, B_pad - B), (0, 0))) if B_pad != B else x

    # Host-side weight prep: fuse heads into lane-dense layouts; fold 1/H into wc.
    w1_f = jnp.transpose(w1, (1, 0, 2)).reshape(F, H * HID)   # (F, H*HID), head-major cols
    b1_f = b1.reshape(1, H * HID)
    w2_f = w2.reshape(1, H * HID)
    b2_f = b2.reshape(H).astype(jnp.float32)                  # SMEM scalars
    wc_s = wc * (1.0 / num_heads)                             # exact fold of mean-over-heads
    bc_f = bc.reshape(1, F)

    kernel = functools.partial(mha_gate_kernel, num_heads, HID)

    def rep(shape):  # replicated (weight) operand: same block for every grid step
        return pl.BlockSpec(shape, lambda i: (0, 0))

    out = pl.pallas_call(
        kernel,
        out_shape=jax.ShapeDtypeStruct((B_pad, F), jnp.float32),
        grid=(B_pad // tile_b,),
        in_specs=[
            pl.BlockSpec((tile_b, F), lambda i: (i, 0)),            # x (batch-tiled)
            rep((F, H * HID)),                                      # fused W1
            rep((1, H * HID)),                                      # fused b1
            rep((1, H * HID)),                                      # fused W2
            pl.BlockSpec(memory_space=pltpu.MemorySpace.SMEM),      # b2 scalars
            rep((F, F)),                                            # wc (pre-scaled)
            rep((1, F)),                                            # bc
        ],
        out_specs=pl.BlockSpec((tile_b, F), lambda i: (i, 0)),
        compiler_params=pltpu.CompilerParams(
            dimension_semantics=("parallel",)),
    )(x_in, w1_f, b1_f, w2_f, b2_f, wc_s, bc_f)

    return out[:B] if B_pad != B else out


def reference(x, w1, b1, w2, b2, wc, bc, num_heads=4):
    outs = []
    for h in range(num_heads):
        h1 = jnp.maximum(x @ w1[h] + b1[h][None, :], 0.0)
        logit = h1 @ w2[h][:, None] + b2[h]
        outs.append(x * jax.nn.sigmoid(logit))
    combined = jnp.stack(outs).mean(axis=0)
    return combined @ wc + bc


if __name__ == "__main__":
    B, F, H, HID = 8, 32, 4, 256   # batch, in_features, num_heads, head-MLP hidden

    key = jax.random.PRNGKey(0)
    kx, k1, k2, k3, k4, k5, k6 = jax.random.split(key, 7)

    x = jax.random.normal(kx, (B, F), dtype=jnp.float32)

    # PyTorch Linear params, pre-transposed to (in, out) so kernels compute x @ W.
    w1 = jax.random.normal(k1, (H, F, HID), dtype=jnp.float32) * 0.05   # per-head Linear(F, 256)
    b1 = jax.random.normal(k2, (H, HID), dtype=jnp.float32) * 0.05
    w2 = jax.random.normal(k3, (H, HID), dtype=jnp.float32) * 0.05      # per-head Linear(256, 1)
    b2 = jax.random.normal(k4, (H,), dtype=jnp.float32) * 0.05          # scalar bias per head
    wc = jax.random.normal(k5, (F, F), dtype=jnp.float32) * 0.05        # combine Linear(F, F)
    bc = jax.random.normal(k6, (1, F), dtype=jnp.float32) * 0.05

    out = multi_head_attention(x, w1, b1, w2, b2, wc, bc, num_heads=H)
    out = jax.block_until_ready(out)

    ref = reference(x, w1, b1, w2, b2, wc, bc[0], num_heads=H)
    assert out.shape == (B, F)
    assert jnp.allclose(out, ref, atol=1e-4, rtol=1e-4), "mismatch vs pure-JAX reference"

    print("KERNEL_OK")
</pallas_src>

<mosaic_0001>
module attributes {stable_mosaic.version = 11 : i64} {
  func.func @mha_gate_kernel(%arg0: i32, %arg1: memref<8x32xf32, #tpu.memory_space<vmem>>, %arg2: memref<32x1024xf32, #tpu.memory_space<vmem>>, %arg3: memref<1x1024xf32, #tpu.memory_space<vmem>>, %arg4: memref<1x1024xf32, #tpu.memory_space<vmem>>, %arg5: memref<4xf32, #tpu.memory_space<smem>>, %arg6: memref<32x32xf32, #tpu.memory_space<vmem>>, %arg7: memref<1x32xf32, #tpu.memory_space<vmem>>, %arg8: memref<8x32xf32, #tpu.memory_space<vmem>>) attributes {dimension_semantics = [#tpu.dimension_semantics<parallel>], iteration_bounds = array<i64: 1>, scalar_prefetch = 0 : i64, scratch_operands = 0 : i64, tpu.core_type = #tpu.core_type<tc>, window_params = [{transform_indices = @transform_0, window_bounds = array<i64: 8, 32>}, {pipeline_mode = #tpu.pipeline_mode<synchronous>, transform_indices = @transform_1, window_bounds = array<i64: 32, 1024>}, {pipeline_mode = #tpu.pipeline_mode<synchronous>, transform_indices = @transform_2, window_bounds = array<i64: 1, 1024>}, {pipeline_mode = #tpu.pipeline_mode<synchronous>, transform_indices = @transform_3, window_bounds = array<i64: 1, 1024>}, {transform_indices = @transform_4, window_bounds = array<i64: 4>}, {pipeline_mode = #tpu.pipeline_mode<synchronous>, transform_indices = @transform_5, window_bounds = array<i64: 32, 32>}, {pipeline_mode = #tpu.pipeline_mode<synchronous>, transform_indices = @transform_6, window_bounds = array<i64: 1, 32>}, {transform_indices = @transform_7, window_bounds = array<i64: 8, 32>}]} {
    %c0 = arith.constant 0 : index
    %c0_0 = arith.constant 0 : index
    %0 = vector.load %arg1[%c0, %c0_0] : memref<8x32xf32, #tpu.memory_space<vmem>>, vector<8x32xf32>
    %c0_1 = arith.constant 0 : index
    %c0_2 = arith.constant 0 : index
    %1 = vector.load %arg2[%c0_1, %c0_2] : memref<32x1024xf32, #tpu.memory_space<vmem>>, vector<32x1024xf32>
    %cst = arith.constant dense<0.000000e+00> : vector<8x1024xf32>
    %2 = tpu.matmul %0, %1, %cst {dimension_numbers = #tpu.dot_dimension_numbers<[1], [0], [0], [1], [0, 0, 1, 1], [], []>} : vector<8x32xf32>, vector<32x1024xf32>, vector<8x1024xf32> -> vector<8x1024xf32>
    %c0_3 = arith.constant 0 : index
    %c0_4 = arith.constant 0 : index
    %3 = vector.load %arg3[%c0_3, %c0_4] : memref<1x1024xf32, #tpu.memory_space<vmem>>, vector<1x1024xf32>
    %4 = vector.broadcast %3 : vector<1x1024xf32> to vector<8x1024xf32>
    %5 = arith.addf %2, %4 : vector<8x1024xf32>
    %cst_5 = arith.constant 0.000000e+00 : f32
    %6 = vector.broadcast %cst_5 : f32 to vector<8x1024xf32>
    %7 = arith.maximumf %5, %6 : vector<8x1024xf32>
    %c0_6 = arith.constant 0 : index
    %c0_7 = arith.constant 0 : index
    %8 = vector.load %arg4[%c0_6, %c0_7] : memref<1x1024xf32, #tpu.memory_space<vmem>>, vector<1x1024xf32>
    %9 = vector.broadcast %8 : vector<1x1024xf32> to vector<8x1024xf32>
    %10 = arith.mulf %7, %9 : vector<8x1024xf32>
    %cst_8 = arith.constant 0.000000e+00 : f32
    %11 = vector.broadcast %cst_8 : f32 to vector<8x1xf32>
    %12 = vector.extract_strided_slice %10 {offsets = [0, 0], sizes = [8, 256], strides = [1, 1]} : vector<8x1024xf32> to vector<8x256xf32>
    %cst_9 = arith.constant dense<0.000000e+00> : vector<8xf32>
    %13 = vector.multi_reduction <add>, %12, %cst_9 [1] : vector<8x256xf32> to vector<8xf32>
    %14 = vector.shape_cast %13 : vector<8xf32> to vector<8x1xf32>
    %c0_10 = arith.constant 0 : index
    %15 = memref.load %arg5[%c0_10] : memref<4xf32, #tpu.memory_space<smem>>
    %16 = vector.broadcast %15 : f32 to vector<8x1xf32>
    %17 = arith.addf %14, %16 : vector<8x1xf32>
    %18 = arith.negf %17 : vector<8x1xf32>
    %19 = math.exp %18 : vector<8x1xf32>
    %cst_11 = arith.constant 1.000000e+00 : f32
    %20 = vector.broadcast %cst_11 : f32 to vector<8x1xf32>
    %21 = arith.addf %20, %19 : vector<8x1xf32>
    %22 = arith.divf %20, %21 : vector<8x1xf32>
    %23 = arith.addf %11, %22 : vector<8x1xf32>
    %24 = vector.extract_strided_slice %10 {offsets = [0, 256], sizes = [8, 256], strides = [1, 1]} : vector<8x1024xf32> to vector<8x256xf32>
    %cst_12 = arith.constant dense<0.000000e+00> : vector<8xf32>
    %25 = vector.multi_reduction <add>, %24, %cst_12 [1] : vector<8x256xf32> to vector<8xf32>
    %26 = vector.shape_cast %25 : vector<8xf32> to vector<8x1xf32>
    %c1 = arith.constant 1 : index
    %27 = memref.load %arg5[%c1] : memref<4xf32, #tpu.memory_space<smem>>
    %28 = vector.broadcast %27 : f32 to vector<8x1xf32>
    %29 = arith.addf %26, %28 : vector<8x1xf32>
    %30 = arith.negf %29 : vector<8x1xf32>
    %31 = math.exp %30 : vector<8x1xf32>
    %cst_13 = arith.constant 1.000000e+00 : f32
    %32 = vector.broadcast %cst_13 : f32 to vector<8x1xf32>
    %33 = arith.addf %32, %31 : vector<8x1xf32>
    %34 = arith.divf %32, %33 : vector<8x1xf32>
    %35 = arith.addf %23, %34 : vector<8x1xf32>
    %36 = vector.extract_strided_slice %10 {offsets = [0, 512], sizes = [8, 256], strides = [1, 1]} : vector<8x1024xf32> to vector<8x256xf32>
    %cst_14 = arith.constant dense<0.000000e+00> : vector<8xf32>
    %37 = vector.multi_reduction <add>, %36, %cst_14 [1] : vector<8x256xf32> to vector<8xf32>
    %38 = vector.shape_cast %37 : vector<8xf32> to vector<8x1xf32>
    %c2 = arith.constant 2 : index
    %39 = memref.load %arg5[%c2] : memref<4xf32, #tpu.memory_space<smem>>
    %40 = vector.broadcast %39 : f32 to vector<8x1xf32>
    %41 = arith.addf %38, %40 : vector<8x1xf32>
    %42 = arith.negf %41 : vector<8x1xf32>
    %43 = math.exp %42 : vector<8x1xf32>
    %cst_15 = arith.constant 1.000000e+00 : f32
    %44 = vector.broadcast %cst_15 : f32 to vector<8x1xf32>
    %45 = arith.addf %44, %43 : vector<8x1xf32>
    %46 = arith.divf %44, %45 : vector<8x1xf32>
    %47 = arith.addf %35, %46 : vector<8x1xf32>
    %48 = vector.extract_strided_slice %10 {offsets = [0, 768], sizes = [8, 256], strides = [1, 1]} : vector<8x1024xf32> to vector<8x256xf32>
    %cst_16 = arith.constant dense<0.000000e+00> : vector<8xf32>
    %49 = vector.multi_reduction <add>, %48, %cst_16 [1] : vector<8x256xf32> to vector<8xf32>
    %50 = vector.shape_cast %49 : vector<8xf32> to vector<8x1xf32>
    %c3 = arith.constant 3 : index
    %51 = memref.load %arg5[%c3] : memref<4xf32, #tpu.memory_space<smem>>
    %52 = vector.broadcast %51 : f32 to vector<8x1xf32>
    %53 = arith.addf %50, %52 : vector<8x1xf32>
    %54 = arith.negf %53 : vector<8x1xf32>
    %55 = math.exp %54 : vector<8x1xf32>
    %cst_17 = arith.constant 1.000000e+00 : f32
    %56 = vector.broadcast %cst_17 : f32 to vector<8x1xf32>
    %57 = arith.addf %56, %55 : vector<8x1xf32>
    %58 = arith.divf %56, %57 : vector<8x1xf32>
    %59 = arith.addf %47, %58 : vector<8x1xf32>
    %60 = vector.broadcast %59 : vector<8x1xf32> to vector<8x32xf32>
    %61 = arith.mulf %0, %60 : vector<8x32xf32>
    %c0_18 = arith.constant 0 : index
    %c0_19 = arith.constant 0 : index
    %62 = vector.load %arg6[%c0_18, %c0_19] : memref<32x32xf32, #tpu.memory_space<vmem>>, vector<32x32xf32>
    %cst_20 = arith.constant dense<0.000000e+00> : vector<8x32xf32>
    %63 = tpu.matmul %61, %62, %cst_20 {dimension_numbers = #tpu.dot_dimension_numbers<[1], [0], [0], [1], [0, 0, 1, 1], [], []>} : vector<8x32xf32>, vector<32x32xf32>, vector<8x32xf32> -> vector<8x32xf32>
    %c0_21 = arith.constant 0 : index
    %c0_22 = arith.constant 0 : index
    %64 = vector.load %arg7[%c0_21, %c0_22] : memref<1x32xf32, #tpu.memory_space<vmem>>, vector<1x32xf32>
    %65 = vector.broadcast %64 : vector<1x32xf32> to vector<8x32xf32>
    %66 = arith.addf %63, %65 : vector<8x32xf32>
    %c0_23 = arith.constant 0 : index
    %c0_24 = arith.constant 0 : index
    %67 = vector.load %arg8[%c0_23, %c0_24] : memref<8x32xf32, #tpu.memory_space<vmem>>, vector<8x32xf32>
    tpu.vector_store %arg8[%c0_23, %c0_24], %66 {strides = array<i32>} : memref<8x32xf32, #tpu.memory_space<vmem>>, vector<8x32xf32>,
    return
  }
  func.func @transform_0(%arg0: i32) -> (i32, i32) {
    %c0_i32 = arith.constant 0 : i32
    %c0_i32_0 = arith.constant 0 : i32
    return %arg0, %c0_i32 : i32, i32
  }
  func.func @transform_1(%arg0: i32) -> (i32, i32) {
    %c0_i32 = arith.constant 0 : i32
    %c0_i32_0 = arith.constant 0 : i32
    %c0_i32_1 = arith.constant 0 : i32
    return %c0_i32, %c0_i32_0 : i32, i32
  }
  func.func @transform_2(%arg0: i32) -> (i32, i32) {
    %c0_i32 = arith.constant 0 : i32
    %c0_i32_0 = arith.constant 0 : i32
    %c0_i32_1 = arith.constant 0 : i32
    return %c0_i32, %c0_i32_0 : i32, i32
  }
  func.func @transform_3(%arg0: i32) -> (i32, i32) {
    %c0_i32 = arith.constant 0 : i32
    %c0_i32_0 = arith.constant 0 : i32
    %c0_i32_1 = arith.constant 0 : i32
    return %c0_i32, %c0_i32_0 : i32, i32
  }
  func.func @transform_4(%arg0: i32) -> i32 {
    %c0_i32 = arith.constant 0 : i32
    %c0_i32_0 = arith.constant 0 : i32
    return %c0_i32 : i32
  }
  func.func @transform_5(%arg0: i32) -> (i32, i32) {
    %c0_i32 = arith.constant 0 : i32
    %c0_i32_0 = arith.constant 0 : i32
    %c0_i32_1 = arith.constant 0 : i32
    return %c0_i32, %c0_i32_0 : i32, i32
  }
  func.func @transform_6(%arg0: i32) -> (i32, i32) {
    %c0_i32 = arith.constant 0 : i32
    %c0_i32_0 = arith.constant 0 : i32
    %c0_i32_1 = arith.constant 0 : i32
    return %c0_i32, %c0_i32_0 : i32, i32
  }
  func.func @transform_7(%arg0: i32) -> (i32, i32) {
    %c0_i32 = arith.constant 0 : i32
    %c0_i32_0 = arith.constant 0 : i32
    return %arg0, %c0_i32 : i32, i32
  }
}

</mosaic_0001>

<bundles_post_ra>
// kernel: tpu_custom_call.1
= control target key start
LH: loop header
LB: loop body
LE: loop exit
PB: predicated region body
PF: predicated region fallthrough
CT: control target
= control target key end

     0   :  { %12 = vsyncpa [#allocation3], 0  ;;  %s838_s0 = inlined_call_operand.hbm [shape: f32[8,32], index: 0, kind: input, shape index: {}]   ;;  %s839_s1 = inlined_call_operand.hbm [shape: f32[32,1024], index: 1, kind: input, shape index: {}]   ;;  %s840_s2 = inlined_call_operand.hbm [shape: f32[1,1024], index: 2, kind: input, shape index: {}]   ;;  %s841_s3 = inlined_call_operand.hbm [shape: f32[1,1024], index: 3, kind: input, shape index: {}]   ;;  %s842_s4 = inlined_call_operand.vmem [shape: f32[4], index: 4, kind: input, shape index: {}]   ;;  %s843_s5 = inlined_call_operand.hbm [shape: f32[32,32], index: 5, kind: input, shape index: {}]   ;;  %s844_s6 = inlined_call_operand.vmem [shape: f32[1,32], index: 6, kind: input, shape index: {}]   ;;  %s845_s7 = inlined_call_operand.hbm [shape: f32[8,32], index: 7, kind: output, shape index: {}]  }
   0x1   :  { %13 = vsyncpa [#allocation7], 0 }
   0x2   :  { %14 = vsyncpa [#allocation10], 0 }
   0x3   :  { %15 = vsyncpa [#allocation5], 0  ;;  %s32_s26 = sshll.u32 %s839_s1, 4  ;;  %s33_s26 = int_to_ptr.hbm [resolvable:$true] %s32_s26 }
   0x4   :  { %16 = vsyncpa [#allocation4], 0  ;;  %s730_s27 = smov [#allocation6]   ;;  %s57_s8 = sshll.u32 %s841_s3, 4  ;;  %s58_s8 = int_to_ptr.hbm [resolvable:$true] %s57_s8 }
   0x5   :  { %s34_s28 = sshll.u32 %s730_s27, 4  ;;  %s731_s9 = smov 1024   ;;  %s35_s28 = int_to_ptr.vmem [resolvable:$true] %s34_s28 }
   0x6   :  { %s732_s10 = smov 64   ;;  %s733_s11 = smov [#allocation9]  }
   0x7   :  { %40 = dma.hbm_to_vmem [thread:$0]  %s33_s26, 4096, %s35_s28, [#allocation7], %s731_s9, %s731_s9, %s732_s10  }
   0x8   :  { %s59_s12 = sshll.u32 %s733_s11, 4  ;;  %s22_s15 = sshll.u32 %s838_s0, 4  ;;  %s60_s12 = int_to_ptr.vmem [resolvable:$true] %s59_s12  ;;  %s23_s15 = int_to_ptr.hbm [resolvable:$true] %s22_s15 }
   0x9   :  { %62 = dma.hbm_to_vmem [thread:$0]  %s58_s8, 128, %s60_s12, [#allocation10]  }
   0xa   :  { %s46_s17 = sshll.u32 %s840_s2, 4  ;;  %s734_s18 = smov [#allocation2]   ;;  %s47_s17 = int_to_ptr.hbm [resolvable:$true] %s46_s17 }
   0xb   :  { %s24_s19 = sshll.u32 %s734_s18, 4  ;;  %s735_s3 = smov [#allocation8]   ;;  %s25_s19 = int_to_ptr.vmem [resolvable:$true] %s24_s19 }
   0xc   :  { %27 = dma.hbm_to_vmem [thread:$0]  %s23_s15, 128, %s25_s19, [#allocation3]  }
   0xd   :  { %s48_s20 = sshll.u32 %s735_s3, 4  ;;  %s68_s23 = sshll.u32 %s842_s4, 4  ;;  %s49_s20 = int_to_ptr.vmem [resolvable:$true] %s48_s20  ;;  %s69_s23 = int_to_ptr.vmem [resolvable:$true] %s68_s23 }
   0xe   :  { %51 = dma.hbm_to_vmem [thread:$0]  %s47_s17, 128, %s49_s20, [#allocation7]  }
   0xf   :  { %s76_s25 = sshll.u32 %s843_s5, 4  ;;  %s736_s26 = smov [#allocation11]   ;;  %s77_s25 = int_to_ptr.hbm [resolvable:$true] %s76_s25 }
  0x10   :  { %71 = dma.vmem_to_smem %s69_s23, 16, %s736_s26, [#allocation5]  }
  0x11   :  { %s737_s2 = smov [#allocation12]   ;;  %s738_s28 = smov 128  }
  0x12   :  { %s78_s27 = sshll.u32 %s737_s2, 4  ;;  %s739_s29 = smov 8   ;;  %s79_s27 = int_to_ptr.vmem [resolvable:$true] %s78_s27 }
  0x13   :  { %84 = dma.hbm_to_vmem [thread:$0]  %s77_s25, 512, %s79_s27, [#allocation10], %s738_s28, %s738_s28, %s739_s29  }
  0x14   :  { %718 = dma.done.wait [#allocation3], 128  }
  0x15   :  { %719 = vsyncadd [#allocation3], 4294967168 }
  0x16   :  { %720 = dma.done.wait [#allocation7], 4224  }
  0x17   :  { %721 = vsyncadd [#allocation7], 4294963072 }
  0x18   :  { %722 = dma.done.wait [#allocation10], 128  }
  0x19   :  { %723 = vsyncadd [#allocation10], 4294967168 }
  0x1a   :  { %724 = dma.done.wait [#allocation5], 16  }
  0x1b   :  { %725 = vsyncadd [#allocation5], 4294967280 }
  0x1c   :  { %726 = dma.done.wait [#allocation10], 512  }
  0x1d   :  { %727 = vsyncadd [#allocation10], 4294966784 }
  0x1e   :  { %111 = sfence }
  0x1f   :  { %v137_v0 = vld [vmem:[#allocation6 + $0xc0] sm:$0xff]  ;;  %v138_v1 = vld [vmem:[#allocation6 + $0xc8] sm:$0xff]  ;;  %v139_v4 = vld [vmem:[#allocation6 + $0xd0] sm:$0xff]  ;;  %vm163_vm0 = vcmask 261120   ;;  %s364_s4 = sld [smem:[#allocation11]]  ;;  %s740_s11 = smov [#allocation13]  }
  0x20   :  { %v129_v2 = vld [vmem:[#allocation6 + $0x80] sm:$0xff]  ;;  %179 = vmatpush.msra.mxu0 %v137_v0  ;;  %199 = vmatpush.msra.mxu1 %v138_v1  ;;  %v130_v3 = vld [vmem:[#allocation6 + $0x88] sm:$0xff]  ;;  %v140_v5 = vld [vmem:[#allocation6 + $0xd8] sm:$0xff]  ;;  %s527_s5 = sld [smem:[#allocation11 + $0x1]]  ;;  %s503_s12 = sshll.u32 %s740_s11, 4  ;;  %s504_s12 = int_to_ptr.vmem [resolvable:$true] %s503_s12 }
  0x21   :  { %219 = vmatpush.msra.mxu2 %v139_v4  ;;  %239 = vmatpush.msra.mxu3 %v140_v5  ;;  %v121_v6 = vld [vmem:[#allocation6 + $0x40] sm:$0xff]  ;;  %v122_v7 = vld [vmem:[#allocation6 + $0x48] sm:$0xff]  ;;  %v131_v8 = vld [vmem:[#allocation6 + $0x90] sm:$0xff]  ;;  %s529_s30 = sld [smem:[#allocation11 + $0x2]]  ;;  %s505_s15 = sshll.u32 %s845_s7, 4  ;;  %s506_s15 = int_to_ptr.hbm [resolvable:$true] %s505_s15 }
  0x22   :  { %180 = vmatpush.msra.mxu0 %v129_v2  ;;  %200 = vmatpush.msra.mxu1 %v130_v3  ;;  %v132_v9 = vld [vmem:[#allocation6 + $0x98] sm:$0xff]  ;;  %v113_v10 = vld [vmem:[#allocation6] sm:$0xff]  ;;  %v114_v11 = vld [vmem:[#allocation6 + $0x8] sm:$0xff]  ;;  %s531_s8 = sld [smem:[#allocation11 + $0x3]] }
  0x23   :  { %220 = vmatpush.msra.mxu2 %v131_v8  ;;  %240 = vmatpush.msra.mxu3 %v132_v9  ;;  %v123_v12 = vld [vmem:[#allocation6 + $0x50] sm:$0xff]  ;;  %v124_v13 = vld [vmem:[#allocation6 + $0x58] sm:$0xff]  ;;  %v141_v15 = vld [vmem:[#allocation6 + $0xe0] sm:$0xff] }
  0x24   :  { %181 = vmatpush.msra.mxu0 %v121_v6  ;;  %201 = vmatpush.msra.mxu1 %v122_v7  ;;  %v799_v14 = vld [vmem:[#allocation2] sm:$0xff]  ;;  %v142_v16 = vld [vmem:[#allocation6 + $0xe8] sm:$0xff]  ;;  %v115_v17 = vld [vmem:[#allocation6 + $0x10] sm:$0xff] }
  0x25   :  { %221 = vmatpush.msra.mxu2 %v123_v12  ;;  %241 = vmatpush.msra.mxu3 %v124_v13  ;;  %v116_v18 = vld [vmem:[#allocation6 + $0x18] sm:$0xff]  ;;  %v133_v19 = vld [vmem:[#allocation6 + $0xa0] sm:$0xff]  ;;  %v134_v20 = vld [vmem:[#allocation6 + $0xa8] sm:$0xff] }
  0x26   :  { %182 = vmatpush.msra.mxu0 %v113_v10  ;;  %202 = vmatpush.msra.mxu1 %v114_v11  ;;  %v143_v21 = vld [vmem:[#allocation6 + $0xf0] sm:$0xff]  ;;  %v144_v22 = vld [vmem:[#allocation6 + $0xf8] sm:$0xff]  ;;  %v125_v23 = vld [vmem:[#allocation6 + $0x60] sm:$0xff] }
  0x27   :  { %518 = vmatmul.msk.f32.vlgmr.msra.gmra.mxu0 %vm163_vm0, %v799_v14  ;;  %519 = vmatmul.msk.f32.vlgmr.msra.gmra.mxu1 %vm163_vm0, %v799_v14  ;;  %v126_v24 = vld [vmem:[#allocation6 + $0x68] sm:$0xff]  ;;  %v135_v25 = vld [vmem:[#allocation6 + $0xb0] sm:$0xff]  ;;  %v136_v26 = vld [vmem:[#allocation6 + $0xb8] sm:$0xff] }
  0x28   :  { %259 = vmatpush.msrb.mxu0 %v141_v15  ;;  %279 = vmatpush.msrb.mxu1 %v142_v16  ;;  %v117_v27 = vld [vmem:[#allocation6 + $0x20] sm:$0xff]  ;;  %v118_v28 = vld [vmem:[#allocation6 + $0x28] sm:$0xff]  ;;  %v127_v29 = vld [vmem:[#allocation6 + $0x70] sm:$0xff] }
  0x29   :  { %222 = vmatpush.msra.mxu2 %v115_v17  ;;  %242 = vmatpush.msra.mxu3 %v116_v18  ;;  %v128_v30 = vld [vmem:[#allocation6 + $0x78] sm:$0xff]  ;;  %v119_v31 = vld [vmem:[#allocation6 + $0x30] sm:$0xff]  ;;  %v145_v33 = vld [vmem:[#allocation8] sm:$0xff] }
  0x2a   :  { %520 = vmatmul.msk.f32.vlgmr.msra.gmra.mxu2 %vm163_vm0, %v799_v14  ;;  %521 = vmatmul.msk.f32.vlgmr.msra.gmra.mxu3 %vm163_vm0, %v799_v14  ;;  %v120_v32 = vld [vmem:[#allocation6 + $0x38] sm:$0xff]  ;;  %v147_v34 = vperm.slane %v145_v33, 0  ;;  %v148_v35 = vperm.slane %v145_v33, 1  ;;  %v335_v36 = vld [vmem:[#allocation9] sm:$0xff]  ;;  %v149_v47 = vperm.slane %v145_v33, 2  ;;  %v150_v48 = vperm.slane %v145_v33, 3 }
  0x2b   :  { %260 = vmatpush.msrb.mxu0 %v133_v19  ;;  %280 = vmatpush.msrb.mxu1 %v134_v20  ;;  %v337_v41 = vperm.slane %v335_v36, 0  ;;  %v338_v42 = vperm.slane %v335_v36, 1  ;;  %v151_v49 = vperm.slane %v145_v33, 4  ;;  %v152_v50 = vperm.slane %v145_v33, 5 }
  0x2c   :  { %299 = vmatpush.msrb.mxu2 %v143_v21  ;;  %319 = vmatpush.msrb.mxu3 %v144_v22  ;;  %v339_v55 = vperm.slane %v335_v36, 2  ;;  %v340_v57 = vperm.slane %v335_v36, 3  ;;  %v341_v62 = vperm.slane %v335_v36, 4  ;;  %v342_v63 = vperm.slane %v335_v36, 5 }
  0x2d   :  { %261 = vmatpush.msrb.mxu0 %v125_v23  ;;  %281 = vmatpush.msrb.mxu1 %v126_v24  ;;  %v153_v6 = vperm.slane %v145_v33, 6  ;;  %v154_v7 = vperm.slane %v145_v33, 7  ;;  %v343_v16 = vperm.slane %v335_v36, 6  ;;  %v344_v18 = vperm.slane %v335_v36, 7 }
  0x2e   :  { %300 = vmatpush.msrb.mxu2 %v135_v25  ;;  %320 = vmatpush.msrb.mxu3 %v136_v26  ;;  %v365_v24 = vstv %s364_s4 }
  0x2f   :  { %262 = vmatpush.msrb.mxu0 %v117_v27  ;;  %282 = vmatpush.msrb.mxu1 %v118_v28  ;;  %v391_v28 = vstv %s527_s5 }
  0x30   :  { %301 = vmatpush.msrb.mxu2 %v127_v29  ;;  %321 = vmatpush.msrb.mxu3 %v128_v30  ;;  %v417_v29 = vstv %s529_s30 }
  0x31   :  { %522 = vmatmul.msk.f32.vlgmr.msrb.gmra.mxu0 %vm163_vm0, %v799_v14  ;;  %523 = vmatmul.msk.f32.vlgmr.msrb.gmra.mxu1 %vm163_vm0, %v799_v14 }
  0x32   :  { %302 = vmatpush.msrb.mxu2 %v119_v31  ;;  %322 = vmatpush.msrb.mxu3 %v120_v32 }
  0x33   :  { %524 = vmatmul.msk.f32.vlgmr.msrb.gmra.mxu2 %vm163_vm0, %v799_v14  ;;  %525 = vmatmul.msk.f32.vlgmr.msrb.gmra.mxu3 %vm163_vm0, %v799_v14 }
  0xa4   :  { %v184_v37 = vpop.f32.mrf.mxu0  ;;  %v204_v38 = vpop.f32.mrf.mxu1 }
  0xa5   :  { %v185_v39 = vadd.f32 %v184_v37, %v147_v34  ;;  %v205_v40 = vadd.f32 %v204_v38, %v148_v35  ;;  %v469_v38 = vld [vmem:[#allocation12 + $0x18] sm:$0xff] }
  0xa6   :  { %489 = vmatpush.msra.mxu0 %v469_v38 }
  0xa7   :  { %v327_v43 = vmax.f32 %v185_v39, 0.0  ;;  %v328_v44 = vmax.f32 %v205_v40, 0.0  ;;  %v468_v39 = vld [vmem:[#allocation12 + $0x10] sm:$0xff]  ;;  %v467_v40 = vld [vmem:[#allocation12 + $0x8] sm:$0xff] }
  0xa8   :  { %490 = vmatpush.msra.mxu0 %v468_v39 }
  0xa9   :  { %v353_v45 = vmul.f32 %v337_v41, %v327_v43  ;;  %v354_v46 = vmul.f32 %v338_v42, %v328_v44  ;;  %v443_v41 = vstv %s531_s8  ;;  %v466_v42 = vld [vmem:[#allocation12] sm:$0xff] }
  0xaa   :  { %491 = vmatpush.msra.mxu0 %v467_v40 }
  0xab   :  { %v361_v51 = vadd.f32 %v354_v46, %v353_v45 }
  0xac   :  { %492 = vmatpush.msra.mxu0 %v466_v42 }
  0xad   :  { %v224_v52 = vpop.f32.mrf.mxu2  ;;  %v244_v53 = vpop.f32.mrf.mxu3  ;;  %362 = vadd.xlane.f32.xlu0 %v361_v51 }
  0xae   :  { %v225_v54 = vadd.f32 %v224_v52, %v149_v47  ;;  %v245_v56 = vadd.f32 %v244_v53, %v150_v48  ;;  %v264_v58 = vpop.f32.mrf.mxu0  ;;  %v284_v59 = vpop.f32.mrf.mxu1 }
  0xaf   :  { %v265_v60 = vadd.f32 %v264_v58, %v151_v49  ;;  %v285_v61 = vadd.f32 %v284_v59, %v152_v50 }
  0xb0   :  { %v329_v0 = vmax.f32 %v225_v54, 0.0  ;;  %v330_v1 = vmax.f32 %v245_v56, 0.0 }
  0xb1   :  { %v331_v2 = vmax.f32 %v265_v60, 0.0  ;;  %v332_v3 = vmax.f32 %v285_v61, 0.0 }
  0xb2   :  { %v355_v4 = vmul.f32 %v339_v55, %v329_v0  ;;  %v356_v5 = vmul.f32 %v340_v57, %v330_v1 }
  0xb3   :  { %v357_v8 = vmul.f32 %v341_v62, %v331_v2  ;;  %v358_v9 = vmul.f32 %v342_v63, %v332_v3 }
  0xb4   :  { %v387_v10 = vadd.f32 %v356_v5, %v355_v4 }
  0xb5   :  { %v413_v11 = vadd.f32 %v358_v9, %v357_v8 }
  0xb6   :  { %v304_v12 = vpop.f32.mrf.mxu2  ;;  %v324_v13 = vpop.f32.mrf.mxu3  ;;  %388 = vadd.xlane.f32.xlu0 %v387_v10 }
  0xb7   :  { %v305_v15 = vadd.f32 %v304_v12, %v153_v6  ;;  %v325_v17 = vadd.f32 %v324_v13, %v154_v7  ;;  %414 = vadd.xlane.f32.xlu1 %v413_v11 }
  0xb9   :  { %v333_v19 = vmax.f32 %v305_v15, 0.0  ;;  %v334_v20 = vmax.f32 %v325_v17, 0.0 }
  0xbb   :  { %v359_v21 = vmul.f32 %v343_v16, %v333_v19  ;;  %v360_v22 = vmul.f32 %v344_v18, %v334_v20 }
  0xbd   :  { %v439_v23 = vadd.f32 %v360_v22, %v359_v21 }
  0xbf   :  { %440 = vadd.xlane.f32.xlu1 %v439_v23 }
 0x120   :  { %v363_v25 = vpop.xlane.xlu0 %362 }
 0x121   :  { %v366_v26 = vadd.f32 %v365_v24, %v363_v25 }
 0x123   :  { %v526_v27 = vmul.f32 -1.442695, %v366_v26 }
 0x125   :  { %546 = vpow2.f32 %v526_v27 }
 0x129   :  { %v389_v30 = vpop.xlane.xlu0 %388 }
 0x12a   :  { %v415_v31 = vpop.xlane.xlu1 %414  ;;  %v392_v32 = vadd.f32 %v391_v28, %v389_v30 }
 0x12b   :  { %v547_v33 = vpop.eup %546  ;;  %v418_v34 = vadd.f32 %v417_v29, %v415_v31 }
 0x12c   :  { %v370_v35 = vadd.f32 1.0, %v547_v33  ;;  %v528_v36 = vmul.f32 -1.442695, %v392_v32 }
 0x12d   :  { %v530_v37 = vmul.f32 -1.442695, %v418_v34 }
 0x12e   :  { %548 = vrcp.f32 %v370_v35  ;;  %v380_v61 = vand.u32 2147483647, %v370_v35  ;;  %v382_v2 = vand.u32 2147483648, %v370_v35  ;;  %vm376_vm3 = vweird.f32 %v370_v35 }
 0x12f   :  { %550 = vpow2.f32 %v530_v37 }
 0x130   :  { %552 = vpow2.f32 %v528_v36  ;;  %vm821_vm5 = vcmp.eq.f32.partialorder %v380_v61, 8.507059e+37  ;;  %v383_v13 = vor.u32 1.1754944e-38, %v382_v2 }
 0x132   :  { %v441_v43 = vpop.xlane.xlu1 %440 }
 0x133   :  { %v444_v44 = vadd.f32 %v443_v41, %v441_v43 }
 0x134   :  { %v549_v45 = vpop.eup %548 }
 0x135   :  { %v551_v46 = vpop.eup %550  ;;  %v532_v47 = vmul.f32 -1.442695, %v444_v44  ;;  %v372_v50 = vmul.f32 %v549_v45, %v370_v35  ;;  %vm377_vm1 = vweird.f32 %v549_v45  ;;  %v545_v35 = vld [vmem:[%s844_s6] ss:$0 sm:$0xff] }
 0x136   :  { %v553_v48 = vpop.eup %552  ;;  %v422_v49 = vadd.f32 1.0, %v551_v46  ;;  %vm817_vm4 = vmor %vm376_vm3, %vm377_vm1 }
 0x137   :  { %v396_v51 = vadd.f32 1.0, %v553_v48  ;;  %554 = vpow2.f32 %v532_v47  ;;  %v373_v52 = vsub.f32 1.0, %v372_v50 }
 0x138   :  { %556 = vrcp.f32 %v422_v49  ;;  %v434_v15 = vand.u32 2147483648, %v422_v49  ;;  %vm428_vm10 = vweird.f32 %v422_v49  ;;  %v432_v17 = vand.u32 2147483647, %v422_v49 }
 0x139   :  { %558 = vrcp.f32 %v396_v51  ;;  %v374_v57 = vmul.f32 %v549_v45, %v373_v52  ;;  %v408_v63 = vand.u32 2147483648, %v396_v51  ;;  %v406_v4 = vand.u32 2147483647, %v396_v51 }
 0x13a   :  { %vm402_vm6 = vweird.f32 %v396_v51  ;;  %v435_v26 = vor.u32 1.1754944e-38, %v434_v15  ;;  %vm433_vm13 = vcmp.eq.f32.partialorder %v432_v17, 8.507059e+37 }
 0x13b   :  { %v375_v0 = vadd.f32 %v549_v45, %v374_v57  ;;  %v409_v9 = vor.u32 1.1754944e-38, %v408_v63  ;;  %vm407_vm9 = vcmp.eq.f32.partialorder %v406_v4, 8.507059e+37 }
 0x13d   :  { %v555_v53 = vpop.eup %554  ;;  %v379_v10 = vsel %vm817_vm4, %v549_v45, %v375_v0 }
 0x13e   :  { %v557_v54 = vpop.eup %556  ;;  %v448_v55 = vadd.f32 1.0, %v555_v53  ;;  %v384_v20 = vsel %vm821_vm5, %v383_v13, %v379_v10 }
 0x13f   :  { %v559_v56 = vpop.eup %558  ;;  %v424_v58 = vmul.f32 %v557_v54, %v422_v49  ;;  %vm429_vm7 = vweird.f32 %v557_v54 }
 0x140   :  { %v398_v59 = vmul.f32 %v559_v56, %v396_v51  ;;  %560 = vrcp.f32 %v448_v55  ;;  %vm403_vm2 = vweird.f32 %v559_v56  ;;  %vm430_vm11 = vmor %vm428_vm10, %vm429_vm7  ;;  %v458_v21 = vand.u32 2147483647, %v448_v55 }
 0x141   :  { %v425_v60 = vsub.f32 1.0, %v424_v58  ;;  %vm404_vm8 = vmor %vm402_vm6, %vm403_vm2  ;;  %v460_v22 = vand.u32 2147483648, %v448_v55  ;;  %vm454_vm14 = vweird.f32 %v448_v55 }
 0x142   :  { %v399_v62 = vsub.f32 1.0, %v398_v59  ;;  %vm459_vm1 = vcmp.eq.f32.partialorder %v458_v21, 8.507059e+37 }
 0x143   :  { %v426_v1 = vmul.f32 %v557_v54, %v425_v60  ;;  %v461_v28 = vor.u32 1.1754944e-38, %v460_v22 }
 0x144   :  { %v400_v3 = vmul.f32 %v559_v56, %v399_v62 }
 0x145   :  { %v427_v11 = vadd.f32 %v557_v54, %v426_v1 }
 0x146   :  { %v561_v5 = vpop.eup %560  ;;  %v401_v8 = vadd.f32 %v559_v56, %v400_v3 }
 0x147   :  { %v450_v12 = vmul.f32 %v561_v5, %v448_v55  ;;  %v431_v23 = vsel %vm430_vm11, %v557_v54, %v427_v11  ;;  %vm455_vm12 = vweird.f32 %v561_v5 }
 0x148   :  { %v405_v16 = vsel %vm404_vm8, %v559_v56, %v401_v8  ;;  %vm456_vm15 = vmor %vm454_vm14, %vm455_vm12  ;;  %v436_v29 = vsel %vm433_vm13, %v435_v26, %v431_v23 }
 0x149   :  { %v410_v18 = vsel %vm407_vm9, %v409_v9, %v405_v16  ;;  %v451_v19 = vsub.f32 1.0, %v450_v12 }
 0x14a   :  { %v412_v25 = vadd.f32 %v410_v18, %v384_v20 }
 0x14b   :  { %v452_v24 = vmul.f32 %v561_v5, %v451_v19 }
 0x14c   :  { %v438_v30 = vadd.f32 %v436_v29, %v412_v25 }
 0x14d   :  { %v453_v27 = vadd.f32 %v561_v5, %v452_v24 }
 0x14f   :  { %v457_v31 = vsel %vm456_vm15, %v561_v5, %v453_v27 }
 0x150   :  { %v462_v32 = vsel %vm459_vm1, %v461_v28, %v457_v31 }
 0x151   :  { %v464_v33 = vadd.f32 %v462_v32, %v438_v30 }
 0x153   :  { %v465_v34 = vmul.f32 %v464_v33, %v799_v14 }
 0x155   :  { %533 = vmatmul.msk.f32.vlgmr.msra.gmra.mxu0 %vm163_vm0, %v465_v34 }
 0x1d2   :  { %v494_v36 = vpop.f32.mrf.mxu0 }
 0x1d3   :  { %v495_v37 = vadd.f32 %v545_v35, %v494_v36 }
 0x1d5   :  { %497 = vst.msk [vmem:[#allocation13] sm:$0xff] %vm163_vm0, %v495_v37 }
 0x1d6   :  { %508 = dma.vmem_to_hbm [thread:$0]  %s504_s12, 128, %s506_s15, [#allocation4]  }
 0x1d7   :  { %728 = dma.done.wait [#allocation4], 128  }
 0x1d8   :  { %729 = vsyncadd [#allocation4], 4294967168 }
 0x1d9   :  { %513 = vsyncpa [#allocation3], 1 }
 0x1da   :  { %514 = vsyncpa [#allocation7], 1 }
 0x1db   :  { %515 = vsyncpa [#allocation10], 1 }
 0x1dc   :  { %516 = vsyncpa [#allocation4], 1 }
 0x1dd   :  { %517 = vsyncpa [#allocation5], 1 }

</bundles_post_ra>
